<compile_context>
chip_gen: v7x
topology: tpu7x:2x2x1
jax: 0.10.0
libtpu: 0.0.40
codegen_flags: <defaults>
</compile_context>

<pallas_src>
import functools

import jax
import jax.numpy as jnp
from jax.experimental import pallas as pl
from jax.experimental.pallas import tpu as pltpu

EPS = 1e-5                        # nn.BatchNorm2d default eps
VMEM_LIMIT = 40 * 1024 * 1024     # raised scoped-VMEM limit, safe on v5e/v6e/v7x
DEFAULT_BLOCK_BYTES = 4 << 20     # ~4 MiB x-blocks (per-generation sweet spot)
FUSED_F32_BYTES = 4 << 20         # fused single-pass path if f32 working copy fits


def _round_up(a, b):
    return -(-a // b) * b


# ----------------------------------------------------------------------------
# Kernel A: per-tile, per-channel partial statistics (sum, sum of squares).
# ----------------------------------------------------------------------------
def _stats_kernel(x_ref, stat_ref, *, lanes, tl, need_lane_mask):
    # x_ref:    (TN, C, TL) native-dtype tile of the (N, C, H*W) view.
    # stat_ref: (1, 1, 2, C) f32 partials [sum, sumsq] (single fused output).
    x = x_ref[...].astype(jnp.float32)
    if need_lane_mask:  # static flag: only when the last lane tile is ragged
        lane_ids = (pl.program_id(1) * tl
                    + jax.lax.broadcasted_iota(jnp.int32, x.shape, 2))
        x = jnp.where(lane_ids < lanes, x, 0.0)
    c = x.shape[1]
    s = jnp.sum(jnp.sum(x, axis=0), axis=-1)          # batch-slab adds, lane reduce
    q = jnp.sum(jnp.sum(x * x, axis=0), axis=-1)      # (C,)
    stat_ref[...] = jnp.stack([s, q], axis=0).reshape(1, 1, 2, c)


# ----------------------------------------------------------------------------
# Kernel B: folded BatchNorm (scale/shift) + ReLU.
# ----------------------------------------------------------------------------
def _apply_kernel(x_ref, scale_ref, shift_ref, o_ref):
    # x_ref/o_ref: (TN, C, TL); scale/shift: (1, C, 1) broadcast over batch/lanes.
    x = x_ref[...].astype(jnp.float32)
    y = jnp.maximum(x * scale_ref[...] + shift_ref[...], 0.0)
    o_ref[...] = y.astype(o_ref.dtype)


# ----------------------------------------------------------------------------
# Fused single-pass kernel: whole (N, C, H*W) view resident in VMEM.
# ----------------------------------------------------------------------------
def _fused_kernel(x_ref, gamma_ref, beta_ref, o_ref):
    x = x_ref[...].astype(jnp.float32)                         # (N, C, L)
    m = jnp.float32(x.shape[0] * x.shape[2])
    s = jnp.sum(jnp.sum(x, axis=0, keepdims=True), axis=-1, keepdims=True)
    q = jnp.sum(jnp.sum(x * x, axis=0, keepdims=True), axis=-1, keepdims=True)
    mean = s / m                                               # (1, C, 1)
    # TODO(synk): E[x^2] - mean^2 can lose precision for very large activation
    # magnitudes; a centered/Welford combine would be more robust.
    var = jnp.maximum(q / m - mean * mean, 0.0)
    scale = gamma_ref[...] * jax.lax.rsqrt(var + EPS)          # (1, C, 1)
    shift = beta_ref[...] - mean * scale
    o_ref[...] = jnp.maximum(x * scale + shift, 0.0).astype(o_ref.dtype)


# ----------------------------------------------------------------------------
# Tile chooser for the (N, C, H*W) view: block = (TN, C, TL).
# TN always divides N; TL is a multiple of 128 (or the full lane dim), so only
# the lane axis can ever need remainder masking.
# ----------------------------------------------------------------------------
def _choose_tiles(n, c, l, itemsize, cap_bytes):
    c_pad = _round_up(c, 8)                               # sublane padding estimate
    cap = max(cap_bytes, 128 * c_pad * itemsize)          # always allow a 128-lane block
    max_tl = max(128, cap // (c_pad * itemsize))
    if l <= max_tl:
        tl = l                                            # full lane dim (any alignment)
    elif l % 128 == 0:
        tl = 128
        t = (max_tl // 128) * 128
        while t >= 128:                                   # largest 128-mult divisor of L
            if l % t == 0:
                tl = t
                break
            t -= 128
    else:
        tl = (max_tl // 128) * 128                        # ragged tail masked in-kernel
    tn = 1
    for t in range(n, 0, -1):                             # largest divisor of N that fits
        if n % t == 0 and t * c_pad * tl * itemsize <= cap:
            tn = t
            break
    return tn, tl


# ----------------------------------------------------------------------------
# Wrapper: zero-copy layout, dispatch, BN stat folding, pallas_call plumbing.
# ----------------------------------------------------------------------------
def br_forward(x_nchw, gamma, beta, *,
               block_bytes=DEFAULT_BLOCK_BYTES,
               fused_vmem_bytes=FUSED_F32_BYTES):
    n, c, h, w = x_nchw.shape
    l = h * w
    x3 = x_nchw.reshape(n, c, l)                          # zero-copy NCHW-native view
    itemsize = jnp.dtype(x_nchw.dtype).itemsize
    c_pad = _round_up(c, 8)

    gamma_f = gamma.astype(jnp.float32).reshape(1, c, 1)
    beta_f = beta.astype(jnp.float32).reshape(1, c, 1)

    # ---- fused single-pass path (small feature maps): one HBM read of x ----
    if n * c_pad * l * 4 <= fused_vmem_bytes:
        y3 = pl.pallas_call(
            _fused_kernel,
            out_shape=jax.ShapeDtypeStruct((n, c, l), x_nchw.dtype),
            compiler_params=pltpu.CompilerParams(vmem_limit_bytes=VMEM_LIMIT),
        )(x3, gamma_f, beta_f)
        return y3.reshape(n, c, h, w)

    # ---- two-pass path ----
    tn, tl = _choose_tiles(n, c, l, itemsize, block_bytes)
    gn, gl = n // tn, pl.cdiv(l, tl)
    x_spec = pl.BlockSpec((tn, c, tl), lambda i, j: (i, 0, j))
    cparams = pltpu.CompilerParams(
        dimension_semantics=("parallel", "parallel"),
        vmem_limit_bytes=VMEM_LIMIT)

    # pass 1: per-tile per-channel [sum, sumsq] partials (one lane-dense output)
    stats = pl.pallas_call(
        functools.partial(_stats_kernel, lanes=l, tl=tl,
                          need_lane_mask=(l % tl != 0)),
        grid=(gn, gl),
        in_specs=[x_spec],
        out_specs=pl.BlockSpec((1, 1, 2, c), lambda i, j: (i, j, 0, 0)),
        out_shape=jax.ShapeDtypeStruct((gn, gl, 2, c), jnp.float32),
        compiler_params=cparams,
    )(x3)

    # glue: fold batch statistics + gamma/beta into per-channel scale/shift
    m = jnp.float32(n * l)
    mean = jnp.sum(stats[:, :, 0, :], axis=(0, 1)) / m                     # (C,)
    # TODO(synk): E[x^2] - mean^2 can cancel for large-magnitude activations;
    # a Welford-style combine of the per-tile partials would be more robust.
    var = jnp.maximum(jnp.sum(stats[:, :, 1, :], axis=(0, 1)) / m - mean * mean, 0.0)
    inv = gamma.astype(jnp.float32) * jax.lax.rsqrt(var + EPS)
    scale = inv.reshape(1, c, 1)
    shift = (beta.astype(jnp.float32) - mean * inv).reshape(1, c, 1)

    # pass 2: y = relu(x * scale + shift); output in the input dtype, NCHW-native
    y3 = pl.pallas_call(
        _apply_kernel,
        grid=(gn, gl),
        in_specs=[
            x_spec,
            pl.BlockSpec((1, c, 1), lambda i, j: (0, 0, 0)),
            pl.BlockSpec((1, c, 1), lambda i, j: (0, 0, 0)),
        ],
        out_specs=x_spec,
        out_shape=jax.ShapeDtypeStruct((n, c, l), x_nchw.dtype),
        compiler_params=cparams,
    )(x3, scale, shift)
    return y3.reshape(n, c, h, w)


# ----------------------------------------------------------------------------
# Pure-JAX reference (mirrors the PyTorch forward in training mode).
# ----------------------------------------------------------------------------
def ref_forward(x, gamma, beta):
    x = x.astype(jnp.float32)
    mean = jnp.mean(x, axis=(0, 2, 3), keepdims=True)
    var = jnp.mean((x - mean) ** 2, axis=(0, 2, 3), keepdims=True)
    y = (x - mean) * jax.lax.rsqrt(var + EPS)
    y = y * gamma.reshape(1, -1, 1, 1) + beta.reshape(1, -1, 1, 1)
    return jnp.maximum(y, 0.0)


if __name__ == "__main__":
    key = jax.random.PRNGKey(0)
    kx, kg, kb = jax.random.split(key, 3)
    N, C, H, W = 2, 4, 16, 16
    x = jax.random.normal(kx, (N, C, H, W), jnp.float32)
    gamma = 1.0 + 0.1 * jax.random.normal(kg, (C,), jnp.float32)
    beta = 0.1 * jax.random.normal(kb, (C,), jnp.float32)

    ref = ref_forward(x, gamma, beta)

    # 1) default dispatch (small shape -> fused single-pass kernel)
    out = jax.block_until_ready(br_forward(x, gamma, beta))
    assert out.shape == (N, C, H, W) and out.dtype == x.dtype
    err = float(jnp.max(jnp.abs(out - ref)))
    assert err < 1e-3, f"fused path mismatch: {err}"

    # 2) two-pass path, single tile
    out2 = jax.block_until_ready(br_forward(x, gamma, beta, fused_vmem_bytes=0))
    err2 = float(jnp.max(jnp.abs(out2 - ref)))
    assert err2 < 1e-3, f"two-pass path mismatch: {err2}"

    # 3) two-pass path, multi-tile grid (exercises partial-stat accumulation)
    out3 = jax.block_until_ready(
        br_forward(x, gamma, beta, fused_vmem_bytes=0, block_bytes=4096))
    err3 = float(jnp.max(jnp.abs(out3 - ref)))
    assert err3 < 1e-3, f"tiled two-pass path mismatch: {err3}"

    # 4) bf16 on the wire: output keeps the input dtype
    xb = x.astype(jnp.bfloat16)
    outb = jax.block_until_ready(br_forward(xb, gamma, beta))
    assert outb.dtype == jnp.bfloat16
    errb = float(jnp.max(jnp.abs(outb.astype(jnp.float32)
                                 - ref_forward(xb, gamma, beta))))
    assert errb < 5e-2, f"bf16 path mismatch: {errb}"

    print("KERNEL_OK")
</pallas_src>

<mosaic_0001>
module attributes {stable_mosaic.version = 11 : i64} {
  func.func @_fused_kernel(%arg0: memref<2x4x256xf32, #tpu.memory_space<vmem>>, %arg1: memref<1x4x1xf32, #tpu.memory_space<vmem>>, %arg2: memref<1x4x1xf32, #tpu.memory_space<vmem>>, %arg3: memref<2x4x256xf32, #tpu.memory_space<vmem>>) attributes {dimension_semantics = [], scalar_prefetch = 0 : i64, scratch_operands = 0 : i64, tpu.core_type = #tpu.core_type<tc>} {
    %c0 = arith.constant 0 : index
    %c0_0 = arith.constant 0 : index
    %c0_1 = arith.constant 0 : index
    %0 = vector.load %arg0[%c0, %c0_0, %c0_1] : memref<2x4x256xf32, #tpu.memory_space<vmem>>, vector<2x4x256xf32>
    %cst = arith.constant dense<0.000000e+00> : vector<4x256xf32>
    %1 = vector.multi_reduction <add>, %0, %cst [0] : vector<2x4x256xf32> to vector<4x256xf32>
    %2 = vector.shape_cast %1 : vector<4x256xf32> to vector<1x4x256xf32>
    %cst_2 = arith.constant dense<0.000000e+00> : vector<1x4xf32>
    %3 = vector.multi_reduction <add>, %2, %cst_2 [2] : vector<1x4x256xf32> to vector<1x4xf32>
    %4 = vector.shape_cast %3 : vector<1x4xf32> to vector<1x4x1xf32>
    %5 = arith.mulf %0, %0 : vector<2x4x256xf32>
    %cst_3 = arith.constant dense<0.000000e+00> : vector<4x256xf32>
    %6 = vector.multi_reduction <add>, %5, %cst_3 [0] : vector<2x4x256xf32> to vector<4x256xf32>
    %7 = vector.shape_cast %6 : vector<4x256xf32> to vector<1x4x256xf32>
    %cst_4 = arith.constant dense<0.000000e+00> : vector<1x4xf32>
    %8 = vector.multi_reduction <add>, %7, %cst_4 [2] : vector<1x4x256xf32> to vector<1x4xf32>
    %9 = vector.shape_cast %8 : vector<1x4xf32> to vector<1x4x1xf32>
    %cst_5 = arith.constant 5.120000e+02 : f32
    %10 = vector.broadcast %cst_5 : f32 to vector<1x4x1xf32>
    %11 = arith.divf %4, %10 : vector<1x4x1xf32>
    %cst_6 = arith.constant 5.120000e+02 : f32
    %12 = vector.broadcast %cst_6 : f32 to vector<1x4x1xf32>
    %13 = arith.divf %9, %12 : vector<1x4x1xf32>
    %14 = arith.mulf %11, %11 : vector<1x4x1xf32>
    %15 = arith.subf %13, %14 : vector<1x4x1xf32>
    %cst_7 = arith.constant 0.000000e+00 : f32
    %16 = vector.broadcast %cst_7 : f32 to vector<1x4x1xf32>
    %17 = arith.maximumf %15, %16 : vector<1x4x1xf32>
    %c0_8 = arith.constant 0 : index
    %c0_9 = arith.constant 0 : index
    %c0_10 = arith.constant 0 : index
    %18 = vector.load %arg1[%c0_8, %c0_9, %c0_10] : memref<1x4x1xf32, #tpu.memory_space<vmem>>, vector<1x4x1xf32>
    %cst_11 = arith.constant 9.99999974E-6 : f32
    %19 = vector.broadcast %cst_11 : f32 to vector<1x4x1xf32>
    %20 = arith.addf %17, %19 : vector<1x4x1xf32>
    %21 = math.rsqrt %20 : vector<1x4x1xf32>
    %22 = arith.mulf %18, %21 : vector<1x4x1xf32>
    %c0_12 = arith.constant 0 : index
    %c0_13 = arith.constant 0 : index
    %c0_14 = arith.constant 0 : index
    %23 = vector.load %arg2[%c0_12, %c0_13, %c0_14] : memref<1x4x1xf32, #tpu.memory_space<vmem>>, vector<1x4x1xf32>
    %24 = arith.mulf %11, %22 : vector<1x4x1xf32>
    %25 = arith.subf %23, %24 : vector<1x4x1xf32>
    %26 = vector.broadcast %22 : vector<1x4x1xf32> to vector<2x4x256xf32>
    %27 = arith.mulf %0, %26 : vector<2x4x256xf32>
    %28 = vector.broadcast %25 : vector<1x4x1xf32> to vector<2x4x256xf32>
    %29 = arith.addf %27, %28 : vector<2x4x256xf32>
    %cst_15 = arith.constant 0.000000e+00 : f32
    %30 = vector.broadcast %cst_15 : f32 to vector<2x4x256xf32>
    %31 = arith.maximumf %29, %30 : vector<2x4x256xf32>
    %c0_16 = arith.constant 0 : index
    %c0_17 = arith.constant 0 : index
    %c0_18 = arith.constant 0 : index
    %32 = vector.load %arg3[%c0_16, %c0_17, %c0_18] : memref<2x4x256xf32, #tpu.memory_space<vmem>>, vector<2x4x256xf32>
    tpu.vector_store %arg3[%c0_16, %c0_17, %c0_18], %31 {strides = array<i32>} : memref<2x4x256xf32, #tpu.memory_space<vmem>>, vector<2x4x256xf32>,
    return
  }
}

</mosaic_0001>

<bundles_post_ra>
// kernel: tpu_custom_call.1
= control target key start
LH: loop header
LB: loop body
LE: loop exit
PB: predicated region body
PF: predicated region fallthrough
CT: control target
= control target key end

     0   :  { %8 = vsyncpa [#allocation3], 0  ;;  %s264_s0 = inlined_call_operand.hbm [shape: f32[2,4,256], index: 0, kind: input, shape index: {}]   ;;  %s265_s1 = inlined_call_operand.vmem [shape: f32[1,4,1], index: 1, kind: input, shape index: {}]   ;;  %s266_s2 = inlined_call_operand.vmem [shape: f32[1,4,1], index: 2, kind: input, shape index: {}]   ;;  %s267_s3 = inlined_call_operand.hbm [shape: f32[2,4,256], index: 3, kind: output, shape index: {}]  }
   0x1   :  { %9 = vsyncpa [#allocation4], 0  ;;  %s190_s12 = smov [#allocation2]   ;;  %s142_s16 = scalar_lea.hbm %s264_s0, 256 }
   0x2   :  { %s15_s13 = sshll.u32 %s190_s12, 4  ;;  %p143_p0 = scmp.ne.s32.totalorder %s264_s0, %s142_s16  ;;  %s16_s13 = int_to_ptr.vmem [resolvable:$true] %s15_s13 }
   0x3   :  { %p146_p1 = scmp.lt.u32.totalorder %s142_s16, %s264_s0 }
   0x5   :  { %p148_p2 = pnand %p146_p1, %p143_p0 }
   0x7   :  { %151 = shalt.err (!%p148_p2)
}
   0x8   :  { %s152_s21 = scalar_lea.vmem %s16_s13, 256  ;;  %p157_p4 = scmp.lt.s32.totalorder %s16_s13, %s16_s13 }
   0x9   :  { %p153_p3 = scmp.ne.s32.totalorder %s16_s13, %s152_s21  ;;  %p158_p5 = scmp.lt.s32.totalorder %s152_s21, %s152_s21 }
   0xb   :  { %p159_p6 = por %p158_p5, %p157_p4 }
   0xd   :  { %p160_p7 = pnand %p159_p6, %p153_p3 }
   0xf   :  { %163 = shalt.err (!%p160_p7)
}
  0x10   :  { %s191_s22 = smov 128   ;;  %s192_s23 = smov 8  }
  0x11   :  { %21 = dma.hbm_to_vmem [thread:$0]  %s264_s0, 256, %s16_s13, [#allocation3], %s191_s22, %s191_s22, %s192_s23  }
  0x12   :  { %186 = dma.done.wait [#allocation3], 256  }
  0x13   :  { %187 = vsyncadd [#allocation3], 4294967040  ;;  %vm37_vm0 = vcmask 1043456   ;;  %v29_v0 = vld [vmem:[#allocation2] sm:$0xff]  ;;  %v30_v1 = vld [vmem:[#allocation2 + $0x8] sm:$0xff]  ;;  %v193_v26 = vmov 0   ;;  %v88_v43 = vlaneseq }
  0x14   :  { %v33_v2 = vcombine.high %v29_v0, %v29_v0  ;;  %v34_v3 = vcombine.high %v30_v1, %v30_v1  ;;  %v38_v4 = vsel %vm37_vm0, %v29_v0, 0.0  ;;  %v39_v5 = vsel %vm37_vm0, %v30_v1, 0.0  ;;  %136 = vset.pattern.permute.xlu1 %v193_v26  ;;  %137 = vset.pattern.permute.xlu0 %v193_v26  ;;  %v74_v35 = vld [vmem:[%s265_s1] sm:$0xf]  ;;  %s195_s1 = smov [#allocation5]  }
  0x15   :  { %v40_v6 = vadd.f32 %v39_v5, %v38_v4  ;;  %v49_v7 = vmul.f32 %v29_v0, %v29_v0  ;;  %v50_v8 = vmul.f32 %v30_v1, %v30_v1  ;;  %v78_v38 = vld [vmem:[%s266_s2] sm:$0xf]  ;;  %v194_v41 = vmov 839922192   ;;  %s118_s29 = sshll.u32 %s195_s1, 4  ;;  %s119_s29 = int_to_ptr.vmem [resolvable:$true] %s118_s29 }
  0x16   :  { %v41_v9 = vsel %vm37_vm0, %v33_v2, 0.0  ;;  %v42_v10 = vsel %vm37_vm0, %v34_v3, 0.0  ;;  %v86_v42 = vunpack.c.l.s4 %v194_v41  ;;  %v89_v45 = vshrl.u32 %v88_v43, 7  ;;  %s164_s2 = scalar_lea.vmem %s119_s29, 256  ;;  %p169_p9 = scmp.lt.s32.totalorder %s119_s29, %s119_s29 }
  0x17   :  { %v43_v11 = vadd.f32 %v42_v10, %v41_v9  ;;  %v44_v12 = vsel %vm37_vm0, %v40_v6, 0.0  ;;  %v53_v13 = vcombine.high %v49_v7, %v49_v7  ;;  %v54_v14 = vcombine.high %v50_v8, %v50_v8  ;;  %p165_p8 = scmp.ne.s32.totalorder %s119_s29, %s164_s2  ;;  %p170_p10 = scmp.lt.s32.totalorder %s164_s2, %s164_s2 }
  0x18   :  { %v57_v15 = vsel %vm37_vm0, %v49_v7, 0.0  ;;  %v58_v16 = vsel %vm37_vm0, %v50_v8, 0.0  ;;  %v87_v44 = vunpack.c.0.s8 %v86_v42 }
  0x19   :  { %v45_v17 = vsel %vm37_vm0, %v43_v11, 0.0  ;;  %v59_v18 = vadd.f32 %v58_v16, %v57_v15  ;;  %v60_v19 = vsel %vm37_vm0, %v53_v13, 0.0  ;;  %v61_v20 = vsel %vm37_vm0, %v54_v14, 0.0  ;;  %p171_p11 = por %p170_p10, %p169_p9 }
  0x1a   :  { %v46_v21 = vadd.f32 %v45_v17, %v44_v12  ;;  %v62_v22 = vadd.f32 %v61_v20, %v60_v19  ;;  %v90_v46 = vsub.s32 %v87_v44, %v89_v45 }
  0x1b   :  { %v63_v23 = vsel %vm37_vm0, %v59_v18, 0.0  ;;  %p172_p12 = pnand %p171_p11, %p165_p8 }
  0x1c   :  { %47 = vadd.xlane.f32.xlu0 %v46_v21  ;;  %v64_v24 = vsel %vm37_vm0, %v62_v22, 0.0 }
  0x1d   :  { %v65_v25 = vadd.f32 %v64_v24, %v63_v23 }
  0x20   :  { %66 = vadd.xlane.f32.xlu0 %v65_v25 }
  0xa9   :  { %v48_v27 = vpop.xlane.xlu0 %47 }
  0xaa   :  { %v69_v28 = vmul.f32 0.001953125, %v48_v27 }
  0xac   :  { %v71_v30 = vmul.f32 %v69_v28, %v69_v28 }
  0xad   :  { %v67_v29 = vpop.xlane.xlu0 %66 }
  0xae   :  { %v70_v31 = vmul.f32 0.001953125, %v67_v29 }
  0xb0   :  { %v72_v32 = vsub.f32 %v70_v31, %v71_v30 }
  0xb2   :  { %v73_v33 = vmax.f32 %v72_v32, 0.0 }
  0xb4   :  { %v75_v34 = vadd.f32 1e-05, %v73_v33 }
  0xb6   :  { %140 = vrsqrt.f32 %v75_v34 }
  0xc0   :  { %v141_v36 = vpop.eup %140 }
  0xc1   :  { %v77_v37 = vmul.f32 %v141_v36, %v74_v35 }
  0xc3   :  { %83 = vperm.xlu1 %136, %v77_v37   ;;  %v79_v39 = vmul.f32 %v77_v37, %v69_v28 }
  0xc5   :  { %v80_v40 = vsub.f32 %v78_v38, %v79_v39 }
  0xc7   :  { %97 = vperm.xlu1 %136, %v80_v40  }
 0x142   :  { %v84_v47 = vpop.permute.xlu1 %83 }
 0x143   :  { %v91_v48 = vrot.slane %v84_v47, %v90_v46 }
 0x145   :  { %v93_v50 = vmul.f32 %v91_v48, %v29_v0  ;;  %v94_v51 = vmul.f32 %v91_v48, %v30_v1 }
 0x146   :  { %v98_v49 = vpop.permute.xlu1 %97 }
 0x147   :  { %v105_v52 = vrot.slane %v98_v49, %v90_v46 }
 0x149   :  { %v107_v53 = vadd.f32 %v105_v52, %v93_v50  ;;  %v108_v54 = vadd.f32 %v105_v52, %v94_v51 }
 0x14b   :  { %v109_v55 = vmax.f32 %v107_v53, 0.0  ;;  %v110_v56 = vmax.f32 %v108_v54, 0.0 }
 0x14d   :  { %111 = vst [vmem:[#allocation5] sm:$0xff] %v109_v55  ;;  %112 = vst [vmem:[#allocation5 + $0x8] sm:$0xff] %v110_v56 }
 0x14e   :  { %175 = shalt.err (!%p172_p12)
}
 0x14f   :  { %s176_s5 = scalar_lea.hbm %s267_s3, 256 }
 0x150   :  { %p177_p13 = scmp.ne.s32.totalorder %s267_s3, %s176_s5  ;;  %p180_p0 = scmp.lt.u32.totalorder %s176_s5, %s267_s3 }
 0x152   :  { %p182_p1 = pnand %p180_p0, %p177_p13 }
 0x154   :  { %185 = shalt.err (!%p182_p1)
}
 0x155   :  { %124 = dma.vmem_to_hbm [thread:$0]  %s119_s29, 256, %s267_s3, [#allocation4], %s191_s22, %s191_s22, %s192_s23  }
 0x156   :  { %188 = dma.done.wait [#allocation4], 256  }
 0x157   :  { %189 = vsyncadd [#allocation4], 4294967040 }
 0x158   :  { %128 = vsyncpa [#allocation3], 1 }
 0x159   :  { %129 = vsyncpa [#allocation4], 1 }

</bundles_post_ra>
